<compile_context>
chip_gen: v5e
topology: v5e:2x2
jax: 0.10.0
libtpu: 0.0.40
codegen_flags: <defaults>
</compile_context>

<pallas_src>
import jax
import jax.numpy as jnp
from jax import lax
from jax.experimental import pallas as pl
from jax.experimental.pallas import tpu as pltpu


def new_receiver_kernel(sender_ref, x_ref, w_ref, shift_ref, emb_ref, out_ref):
    # sender_ref: (B,)   int32, SMEM (scalar prefetch) -- class index per batch row
    # x_ref:      (B*N, E) f32  -- all candidate features, batch flattened into rows
    # w_ref:      (E, H)   f32  -- Linear weight, pre-transposed, BN scale folded in
    # shift_ref:  (1, H)   f32  -- folded BN shift = beta - mean * gamma/sqrt(var+eps)
    # emb_ref:    (C, H)   f32  -- full embedding table (gather done in-kernel)
    # out_ref:    (B, N)   f32  -- log-probs
    B, N = out_ref.shape
    H = w_ref.shape[1]

    # Linear (no bias) with the BN scale already folded into the weight: one MXU push.
    feat = jnp.dot(x_ref[...], w_ref[...],
                   preferred_element_type=jnp.float32,
                   precision=lax.Precision.HIGHEST)               # (B*N, H)

    # Folded eval-mode BatchNorm1d shift + ReLU (VPU, f32).
    feat = jnp.maximum(feat + shift_ref[...], 0.0)

    # In-kernel embedding gather: B scalar indices read from SMEM, each selecting one
    # (1, H) row of the VMEM-resident table (dynamic sublane slice), then stacked.
    rows = [emb_ref[pl.ds(sender_ref[b], 1), :] for b in range(B)]
    emb_sel = jnp.concatenate(rows, axis=0)                       # (B, H)

    # h[b, n] = <feat[b, n, :], emb_sel[b, :]> -- VPU multiply + XLU lane reduce
    # instead of a second tiny MXU matmul. (The (B*N,H)->(B,N,H) reshape lowered
    # cleanly / ran in the previous revision at these sizes.)
    feat = feat.reshape(B, N, H)
    h = jnp.sum(feat * emb_sel[:, None, :], axis=-1)              # (B, N)

    # log_softmax over the candidate (lane) axis, written once as a dense slab.
    m = jnp.max(h, axis=-1, keepdims=True)
    s = h - m
    lse = jnp.log(jnp.sum(jnp.exp(s), axis=-1, keepdims=True))
    out_ref[...] = s - lse


def new_receiver_forward(sender_out, receiver_input, params):
    B, N, E = receiver_input.shape
    H = params["w_t"].shape[1]
    C = params["embedding"].shape[0]

    # Fold eval-mode BN into the Linear weight (per-output-channel scale) and a
    # per-channel shift, so the kernel sees one matmul + one add.
    eps = 1e-5
    scale = params["bn_gamma"] / jnp.sqrt(params["bn_var"] + eps)           # (H,)
    w_scaled = params["w_t"] * scale[None, :]                               # (E, H)
    shift = (params["bn_beta"] - params["bn_mean"] * scale).reshape(1, H)   # (1, H)
    x_flat = receiver_input.reshape(B * N, E)                               # (B*N, E)

    flops = 2 * B * N * E * H + 3 * B * N * H + 6 * B * N
    bytes_accessed = (4 * (x_flat.size + w_scaled.size + H + C * H + B * N)
                      + 4 * B)

    vmem = pl.BlockSpec(memory_space=pltpu.MemorySpace.VMEM)
    grid_spec = pltpu.PrefetchScalarGridSpec(
        num_scalar_prefetch=1,   # sender_out -> SMEM; embedding gather fused in-kernel
        grid=(),                 # whole problem (~10 KiB) resident in VMEM: one invocation
        in_specs=[vmem, vmem, vmem, vmem],
        out_specs=vmem,
    )
    out = pl.pallas_call(
        new_receiver_kernel,
        out_shape=jax.ShapeDtypeStruct((B, N), jnp.float32),
        grid_spec=grid_spec,
        cost_estimate=pl.CostEstimate(
            flops=flops,
            transcendentals=B * N + B,
            bytes_accessed=bytes_accessed,
        ),
    )(sender_out.astype(jnp.int32), x_flat, w_scaled, shift, params["embedding"])
    return out


def new_receiver_ref(sender_out, receiver_input, params):
    """Pure-JAX reference for correctness checking (eval-mode BN, no dropout)."""
    eps = 1e-5
    scale = params["bn_gamma"] / jnp.sqrt(params["bn_var"] + eps)
    shift = params["bn_beta"] - params["bn_mean"] * scale
    feat = jnp.einsum("bne,eh->bnh", receiver_input, params["w_t"],
                      precision=lax.Precision.HIGHEST)
    feat = jnp.maximum(feat * scale + shift, 0.0)
    e = params["embedding"][sender_out]                           # (B, H)
    h = jnp.einsum("bnh,bh->bn", feat, e)
    return jax.nn.log_softmax(h, axis=1)


if __name__ == "__main__":
    # Small shapes consistent with the module's forward.
    B, N = 4, 8                 # batch, number of candidate images
    embed_dim, hidden_dim = 32, 32
    num_classes = 10

    key = jax.random.PRNGKey(0)
    k_x, k_s, k_w, k_e, k_g, k_b, k_m, k_v = jax.random.split(key, 8)

    receiver_input = jax.random.normal(k_x, (B, N, embed_dim), dtype=jnp.float32)
    sender_out = jax.random.randint(k_s, (B,), 0, num_classes, dtype=jnp.int32)

    # Deterministic parameter init (synthetic; shapes follow the module's __init__).
    lin_w = jax.random.normal(k_w, (hidden_dim, embed_dim), jnp.float32) * (1.0 / jnp.sqrt(embed_dim))
    params = {
        "w_t": lin_w.T,                                                        # (E, H)
        "embedding": jax.random.normal(k_e, (num_classes, hidden_dim), jnp.float32),
        "bn_gamma": 1.0 + 0.1 * jax.random.normal(k_g, (hidden_dim,), jnp.float32),
        "bn_beta": 0.1 * jax.random.normal(k_b, (hidden_dim,), jnp.float32),
        "bn_mean": 0.1 * jax.random.normal(k_m, (hidden_dim,), jnp.float32),
        "bn_var": jnp.abs(1.0 + 0.1 * jax.random.normal(k_v, (hidden_dim,), jnp.float32)),
    }

    out = new_receiver_forward(sender_out, receiver_input, params)
    out = jax.block_until_ready(out)

    ref = new_receiver_ref(sender_out, receiver_input, params)
    assert out.shape == (B, N)
    assert jnp.allclose(out, ref, atol=1e-5, rtol=1e-5), (out, ref)

    print("KERNEL_OK")
</pallas_src>

<mosaic_0001>
module attributes {stable_mosaic.version = 11 : i64} {
  func.func @new_receiver_kernel(%arg0: memref<4xi32, #tpu.memory_space<smem>>, %arg1: memref<32x32xf32, #tpu.memory_space<vmem>>, %arg2: memref<32x32xf32, #tpu.memory_space<vmem>>, %arg3: memref<1x32xf32, #tpu.memory_space<vmem>>, %arg4: memref<10x32xf32, #tpu.memory_space<vmem>>, %arg5: memref<4x8xf32, #tpu.memory_space<vmem>>) attributes {dimension_semantics = [], scalar_prefetch = 1 : i64, scratch_operands = 0 : i64, tpu.core_type = #tpu.core_type<tc>} {
    %c0 = arith.constant 0 : index
    %c0_0 = arith.constant 0 : index
    %0 = vector.load %arg1[%c0, %c0_0] : memref<32x32xf32, #tpu.memory_space<vmem>>, vector<32x32xf32>
    %c0_1 = arith.constant 0 : index
    %c0_2 = arith.constant 0 : index
    %1 = vector.load %arg2[%c0_1, %c0_2] : memref<32x32xf32, #tpu.memory_space<vmem>>, vector<32x32xf32>
    %cst = arith.constant dense<0.000000e+00> : vector<32x32xf32>
    %2 = tpu.matmul %0, %1, %cst {dimension_numbers = #tpu.dot_dimension_numbers<[1], [0], [0], [1], [0, 0, 1, 1], [], []>, precision = #tpu.contract_precision<fp32>} : vector<32x32xf32>, vector<32x32xf32>, vector<32x32xf32> -> vector<32x32xf32>
    %c0_3 = arith.constant 0 : index
    %c0_4 = arith.constant 0 : index
    %3 = vector.load %arg3[%c0_3, %c0_4] : memref<1x32xf32, #tpu.memory_space<vmem>>, vector<1x32xf32>
    %4 = vector.broadcast %3 : vector<1x32xf32> to vector<32x32xf32>
    %5 = arith.addf %2, %4 : vector<32x32xf32>
    %cst_5 = arith.constant 0.000000e+00 : f32
    %6 = vector.broadcast %cst_5 : f32 to vector<32x32xf32>
    %7 = arith.maximumf %5, %6 : vector<32x32xf32>
    %c0_6 = arith.constant 0 : index
    %8 = memref.load %arg0[%c0_6] : memref<4xi32, #tpu.memory_space<smem>>
    %9 = arith.index_cast %8 : i32 to index
    %c0_7 = arith.constant 0 : index
    %10 = vector.load %arg4[%9, %c0_7] : memref<10x32xf32, #tpu.memory_space<vmem>>, vector<1x32xf32>
    %c1 = arith.constant 1 : index
    %11 = memref.load %arg0[%c1] : memref<4xi32, #tpu.memory_space<smem>>
    %12 = arith.index_cast %11 : i32 to index
    %c0_8 = arith.constant 0 : index
    %13 = vector.load %arg4[%12, %c0_8] : memref<10x32xf32, #tpu.memory_space<vmem>>, vector<1x32xf32>
    %c2 = arith.constant 2 : index
    %14 = memref.load %arg0[%c2] : memref<4xi32, #tpu.memory_space<smem>>
    %15 = arith.index_cast %14 : i32 to index
    %c0_9 = arith.constant 0 : index
    %16 = vector.load %arg4[%15, %c0_9] : memref<10x32xf32, #tpu.memory_space<vmem>>, vector<1x32xf32>
    %c3 = arith.constant 3 : index
    %17 = memref.load %arg0[%c3] : memref<4xi32, #tpu.memory_space<smem>>
    %18 = arith.index_cast %17 : i32 to index
    %c0_10 = arith.constant 0 : index
    %19 = vector.load %arg4[%18, %c0_10] : memref<10x32xf32, #tpu.memory_space<vmem>>, vector<1x32xf32>
    %20 = tpu.concatenate %10, %13, %16, %19 in 0 : vector<1x32xf32>, vector<1x32xf32>, vector<1x32xf32>, vector<1x32xf32> -> vector<4x32xf32>
    %21 = vector.shape_cast %7 : vector<32x32xf32> to vector<4x8x32xf32>
    %22 = vector.shape_cast %20 : vector<4x32xf32> to vector<4x1x32xf32>
    %23 = vector.broadcast %22 : vector<4x1x32xf32> to vector<4x8x32xf32>
    %24 = arith.mulf %21, %23 : vector<4x8x32xf32>
    %cst_11 = arith.constant dense<0.000000e+00> : vector<4x8xf32>
    %25 = vector.multi_reduction <add>, %24, %cst_11 [2] : vector<4x8x32xf32> to vector<4x8xf32>
    %cst_12 = arith.constant dense<0xFF800000> : vector<4xf32>
    %26 = vector.multi_reduction <maximumf>, %25, %cst_12 [1] : vector<4x8xf32> to vector<4xf32>
    %27 = vector.shape_cast %26 : vector<4xf32> to vector<4x1xf32>
    %28 = vector.broadcast %27 : vector<4x1xf32> to vector<4x8xf32>
    %29 = arith.subf %25, %28 : vector<4x8xf32>
    %30 = math.exp %29 : vector<4x8xf32>
    %cst_13 = arith.constant dense<0.000000e+00> : vector<4xf32>
    %31 = vector.multi_reduction <add>, %30, %cst_13 [1] : vector<4x8xf32> to vector<4xf32>
    %32 = vector.shape_cast %31 : vector<4xf32> to vector<4x1xf32>
    %33 = math.log %32 : vector<4x1xf32>
    %34 = vector.broadcast %33 : vector<4x1xf32> to vector<4x8xf32>
    %35 = arith.subf %29, %34 : vector<4x8xf32>
    %c0_14 = arith.constant 0 : index
    %c0_15 = arith.constant 0 : index
    %36 = vector.load %arg5[%c0_14, %c0_15] : memref<4x8xf32, #tpu.memory_space<vmem>>, vector<4x8xf32>
    tpu.vector_store %arg5[%c0_14, %c0_15], %35 {strides = array<i32>} : memref<4x8xf32, #tpu.memory_space<vmem>>, vector<4x8xf32>,
    return
  }
}

</mosaic_0001>

<bundles_post_ra>
// kernel: tpu_custom_call.1
= control target key start
LH: loop header
LB: loop body
LE: loop exit
PB: predicated region body
PF: predicated region fallthrough
CT: control target
= control target key end

     0   :  { %s716_s21 = smov [#allocation3]   ;;  %s866_s0 = inlined_call_operand.hbm [shape: s32[4], index: 0, kind: input, shape index: {}]   ;;  %s867_s1 = inlined_call_operand.hbm [shape: f32[32,32], index: 1, kind: input, shape index: {}]   ;;  %s868_s2 = inlined_call_operand.hbm [shape: f32[32,32], index: 2, kind: input, shape index: {}]   ;;  %s869_s3 = inlined_call_operand.vmem [shape: f32[1,32], index: 3, kind: input, shape index: {}]   ;;  %s870_s4 = inlined_call_operand.hbm [shape: f32[10,32], index: 4, kind: input, shape index: {}]   ;;  %s871_s5 = inlined_call_operand.hbm [shape: f32[4,8], index: 5, kind: output, shape index: {}]  }
   0x1   :  { %s11_s20 = sshll.u32 %s866_s0, 4  ;;  %s12_s20 = int_to_ptr.hbm [resolvable:$true] %s11_s20 }
   0x2   :  { %14 = dma.hbm_to_smem %s12_s20, 16, %s716_s21, [#allocation2] }
   0x3   :  { %708 = dma.done.wait [#allocation2], 16 }
   0x4   :  { %709 = vsyncadd [#allocation2], 4294967280 }
   0x5   :  { %17 = sfence }
   0x6   :  { %18 = vsyncpa [#allocation5], 0 }
   0x7   :  { %19 = vsyncpa [#allocation8], 0 }
   0x8   :  { %20 = vsyncpa [#allocation6], 0  ;;  %s38_s24 = sshll.u32 %s868_s2, 4  ;;  %s717_s25 = smov [#allocation7]   ;;  %s39_s24 = int_to_ptr.hbm [resolvable:$true] %s38_s24 }
   0x9   :  { %s40_s26 = sshll.u32 %s717_s25, 4  ;;  %s25_s0 = sshll.u32 %s867_s1, 4  ;;  %s41_s26 = int_to_ptr.vmem [resolvable:$true] %s40_s26  ;;  %s26_s0 = int_to_ptr.hbm [resolvable:$true] %s25_s0 }
   0xa   :  { %s718_s29 = smov 128   ;;  %s719_s30 = smov 8  }
   0xb   :  { %46 = dma.hbm_to_vmem [thread:$0]  %s39_s24, 512, %s41_s26, [#allocation8], %s718_s29, %s718_s29, %s719_s30  }
   0xc   :  { %s720_s6 = smov [#allocation4]   ;;  %s53_s10 = sshll.u32 %s870_s4, 4  ;;  %s54_s10 = int_to_ptr.hbm [resolvable:$true] %s53_s10 }
   0xd   :  { %s27_s7 = sshll.u32 %s720_s6, 4  ;;  %s721_s2 = smov [#allocation9]   ;;  %s28_s7 = int_to_ptr.vmem [resolvable:$true] %s27_s7 }
   0xe   :  { %33 = dma.hbm_to_vmem [thread:$0]  %s26_s0, 512, %s28_s7, [#allocation5], %s718_s29, %s718_s29, %s719_s30  }
   0xf   :  { %s55_s11 = sshll.u32 %s721_s2, 4  ;;  %s56_s11 = int_to_ptr.vmem [resolvable:$true] %s55_s11 }
  0x10   :  { %61 = dma.hbm_to_vmem [thread:$0]  %s54_s10, 256, %s56_s11, [#allocation8], %s718_s29, %s718_s29, %s719_s30  }
  0x11   :  { %710 = dma.done.wait [#allocation5], 512  }
  0x12   :  { %711 = vsyncadd [#allocation5], 4294966784 }
  0x13   :  { %712 = dma.done.wait [#allocation8], 768  }
  0x14   :  { %713 = vsyncadd [#allocation8], 4294966528  ;;  %vm86_vm0 = vcmask 261120   ;;  %v81_v0 = vld [vmem:[#allocation7 + $0x18] sm:$0xff]  ;;  %v80_v1 = vld [vmem:[#allocation7 + $0x10] sm:$0xff]  ;;  %s567_s1 = sld [smem:[#allocation3 + $0x1]] }
  0x15   :  { %v79_v2 = vld [vmem:[#allocation7 + $0x8] sm:$0xff]  ;;  %v766_v3 = vand.u32 4294901760, %v81_v0  ;;  %v768_v4 = vand.u32 4294901760, %v80_v1  ;;  %v78_v6 = vld [vmem:[#allocation7] sm:$0xff]  ;;  %v76_v7 = vld [vmem:[#allocation4 + $0x10] sm:$0xff]  ;;  %s568_s4 = sld [smem:[#allocation3 + $0x2]] }
  0x16   :  { %v770_v5 = vand.u32 4294901760, %v79_v2  ;;  %v77_v8 = vld [vmem:[#allocation4 + $0x18] sm:$0xff]  ;;  %v772_v9 = vand.u32 4294901760, %v78_v6  ;;  %v94_v10 = vsel %vm86_vm0, %v76_v7, 0  ;;  %v74_v12 = vld [vmem:[#allocation4] sm:$0xff]  ;;  %v75_v13 = vld [vmem:[#allocation4 + $0x8] sm:$0xff] }
  0x17   :  { %v97_v11 = vsel %vm86_vm0, %v77_v8, 0  ;;  %570 = vmatpush.msra.mxu2 %v766_v3  ;;  %v165_v14 = vsub.f32 %v81_v0, %v766_v3  ;;  %v778_v15 = vand.u32 4294901760, %v94_v10  ;;  %v171_v16 = vsub.f32 %v80_v1, %v768_v4  ;;  %112 = vmatpush.msra.mxu0 %v766_v3  ;;  %s381_s12 = sld [smem:[#allocation3]]  ;;  %v589_v60 = vld [vmem:[%s869_s3] ss:$0 sm:$0xff]  ;;  %s723_s3 = smov [#allocation10]  }
  0x18   :  { %v177_v17 = vsub.f32 %v79_v2, %v770_v5  ;;  %v183_v18 = vsub.f32 %v78_v6, %v772_v9  ;;  %v784_v19 = vand.u32 4294901760, %v97_v11  ;;  %v88_v20 = vsel %vm86_vm0, %v74_v12, 0  ;;  %s569_s13 = sld [smem:[#allocation3 + $0x3]]  ;;  %s550_s20 = sshll.u32 %s723_s3, 4  ;;  %s551_s20 = int_to_ptr.vmem [resolvable:$true] %s550_s20 }
  0x19   :  { %v91_v21 = vsel %vm86_vm0, %v75_v13, 0  ;;  %571 = vmatpush.msra.mxu2 %v768_v4  ;;  %v166_v22 = vand.u32 4294901760, %v165_v14  ;;  %v790_v23 = vsub.f32 %v94_v10, %v778_v15  ;;  %v172_v24 = vand.u32 4294901760, %v171_v16  ;;  %114 = vmatpush.msra.mxu0 %v768_v4  ;;  %s552_s23 = sshll.u32 %s871_s5, 4  ;;  %s553_s23 = int_to_ptr.hbm [resolvable:$true] %s552_s23 }
  0x1a   :  { %v178_v25 = vand.u32 4294901760, %v177_v17  ;;  %v184_v26 = vand.u32 4294901760, %v183_v18  ;;  %v794_v27 = vsub.f32 %v97_v11, %v784_v19  ;;  %v119_v28 = vand.u32 4294901760, %v88_v20  ;;  %s385_s14 = scalar_lea.vmem [#allocation9], %s567_s1 }
  0x1b   :  { %v796_v29 = vand.u32 4294901760, %v91_v21  ;;  %572 = vmatpush.msra.mxu2 %v770_v5  ;;  %v167_v30 = vsub.f32 %v165_v14, %v166_v22  ;;  %v137_v31 = vand.u32 4294901760, %v790_v23  ;;  %v173_v32 = vsub.f32 %v171_v16, %v172_v24  ;;  %116 = vmatpush.msra.mxu0 %v770_v5  ;;  %v386_v59 = vld [vmem:[%s385_s14] sm:$0x1]  ;;  %s388_s17 = scalar_lea.vmem [#allocation9], %s568_s4 }
  0x1c   :  { %v179_v33 = vsub.f32 %v177_v17, %v178_v25  ;;  %v185_v34 = vsub.f32 %v183_v18, %v184_v26  ;;  %v120_v35 = vsub.f32 %v88_v20, %v119_v28  ;;  %v145_v40 = vand.u32 4294901760, %v794_v27  ;;  %v389_v62 = vld [vmem:[%s388_s17] sm:$0x1] }
  0x1d   :  { %v128_v36 = vsub.f32 %v91_v21, %v796_v29  ;;  %573 = vmatpush.msra.mxu2 %v772_v9  ;;  %v168_v37 = vand.u32 4294901760, %v167_v30  ;;  %v138_v38 = vsub.f32 %v790_v23, %v137_v31  ;;  %v174_v39 = vand.u32 4294901760, %v173_v32  ;;  %118 = vmatpush.msra.mxu0 %v772_v9  ;;  %s382_s18 = scalar_lea.vmem [#allocation9], %s381_s12 }
  0x1e   :  { %v121_v41 = vand.u32 4294901760, %v120_v35  ;;  %v180_v43 = vand.u32 4294901760, %v179_v33  ;;  %v186_v46 = vand.u32 4294901760, %v185_v34  ;;  %v146_v47 = vsub.f32 %v794_v27, %v145_v40  ;;  %v383_v1 = vld [vmem:[%s382_s18] sm:$0x1]  ;;  %s391_s19 = scalar_lea.vmem [#allocation9], %s569_s13 }
  0x1f   :  { %219 = vmatpush.msrb.mxu2 %v165_v14  ;;  %310 = vmatpush.msrb.mxu0 %v166_v22  ;;  %v139_v42 = vand.u32 4294901760, %v138_v38  ;;  %v129_v45 = vand.u32 4294901760, %v128_v36  ;;  %v394_v63 = vrot.slane %v386_v59, 7  ;;  %vm402_vm1 = vcmask 1040384  }
  0x20   :  { %574 = vmatpush.msra.mxu3 %v168_v37  ;;  %169 = vmatpush.msra.mxu1 %v168_v37  ;;  %v122_v44 = vsub.f32 %v120_v35, %v121_v41  ;;  %v147_v50 = vand.u32 4294901760, %v146_v47  ;;  %vm404_vm2 = vcmask 1041408   ;;  %vm406_vm3 = vcmask 1042432  }
  0x21   :  { %222 = vmatpush.msrb.mxu2 %v171_v16  ;;  %314 = vmatpush.msrb.mxu0 %v172_v24  ;;  %v130_v49 = vsub.f32 %v128_v36, %v129_v45  ;;  %v403_v7 = vsel %vm402_vm1, %v383_v1, %v394_v63  ;;  %vm446_vm4 = vcmask 1041409   ;;  %vm448_vm5 = vcmask 1042434  }
  0x22   :  { %140 = vmatmul.f32.vlgmr.msra.gmra.mxu2 %v139_v42  ;;  %575 = vmatpush.msra.mxu3 %v174_v39  ;;  %v123_v48 = vand.u32 4294901760, %v122_v44  ;;  %vm450_vm6 = vcmask 1043459   ;;  %vm453_vm7 = vcmask 60416  }
  0x23   :  { %175 = vmatpush.msra.mxu1 %v174_v39  ;;  %225 = vmatpush.msrb.mxu2 %v177_v17  ;;  %v131_v51 = vand.u32 4294901760, %v130_v49 }
  0x24   :  { %576 = vmatpush.msra.mxu3 %v180_v43  ;;  %318 = vmatpush.msrb.mxu0 %v178_v25 }
  0x25   :  { %181 = vmatpush.msra.mxu1 %v180_v43  ;;  %124 = vmatmul.f32.vlgmr.msra.gmra.mxu0 %v123_v48 }
  0x26   :  { %577 = vmatpush.msra.mxu3 %v186_v46  ;;  %228 = vmatpush.msrb.mxu2 %v183_v18 }
  0x27   :  { %197 = vmatmul.f32.vlgmr.msra.gmra.mxu3 %v778_v15  ;;  %187 = vmatpush.msra.mxu1 %v186_v46 }
  0x28   :  { %263 = vmatpush.msrb.mxu3 %v766_v3  ;;  %189 = vmatmul.f32.vlgmr.msra.gmra.mxu1 %v119_v28 }
  0x29   :  { %353 = vmatpush.msrb.mxu1 %v766_v3  ;;  %322 = vmatpush.msrb.mxu0 %v184_v26 }
  0x2a   :  { %148 = vmatmul.f32.gmra.mxu2 %v147_v50  ;;  %265 = vmatpush.msrb.mxu3 %v768_v4 }
  0x2b   :  { %355 = vmatpush.msrb.mxu1 %v768_v4  ;;  %v392_v4 = vld [vmem:[%s391_s19] sm:$0x1] }
  0x2c   :  { %267 = vmatpush.msrb.mxu3 %v770_v5 }
  0x2d   :  { %132 = vmatmul.f32.gmra.mxu0 %v131_v51  ;;  %357 = vmatpush.msrb.mxu1 %v770_v5  ;;  %v397_v5 = vrot.slane %v389_v62, 6 }
  0x2e   :  { %269 = vmatpush.msrb.mxu3 %v772_v9 }
  0x2f   :  { %201 = vmatmul.f32.gmra.mxu3 %v784_v19  ;;  %359 = vmatpush.msrb.mxu1 %v772_v9  ;;  %v400_v9 = vrot.slane %v392_v4, 5  ;;  %v405_v11 = vsel %vm404_vm2, %v403_v7, %v397_v5 }
  0x30   :  { %193 = vmatmul.f32.gmra.mxu1 %v796_v29 }
  0x32   :  { %231 = vmatmul.f32.vlgmr.msrb.gmra.mxu2 %v120_v35 }
  0x35   :  { %324 = vmatmul.f32.vlgmr.msrb.gmra.mxu0 %v119_v28 }
  0x37   :  { %273 = vmatmul.f32.vlgmr.msrb.gmra.mxu3 %v121_v41 }
  0x38   :  { %361 = vmatmul.f32.vlgmr.msrb.gmra.mxu1 %v119_v28 }
  0x3a   :  { %236 = vmatmul.f32.gmra.mxu2 %v128_v36 }
  0x3d   :  { %328 = vmatmul.f32.gmra.mxu0 %v796_v29 }
  0x3f   :  { %279 = vmatmul.f32.gmra.mxu3 %v129_v45 }
  0x40   :  { %365 = vmatmul.f32.gmra.mxu1 %v796_v29 }
  0x42   :  { %241 = vmatmul.f32.gmra.mxu2 %v790_v23 }
  0x45   :  { %332 = vmatmul.f32.gmra.mxu0 %v778_v15 }
  0x47   :  { %285 = vmatmul.f32.gmra.mxu3 %v137_v31 }
  0x48   :  { %369 = vmatmul.f32.gmra.mxu1 %v778_v15  ;;  %v407_v15 = vsel %vm406_vm3, %v405_v11, %v400_v9 }
  0x49   :  { %v412_v21 = vperm.slane %v407_v15, 0  ;;  %v409_v29 = vrot.slane %v407_v15, 1  ;;  %v410_v44 = vrot.slane %v407_v15, 2 }
  0x4a   :  { %246 = vmatmul.f32.gmra.mxu2 %v794_v27 }
  0x4b   :  { %v413_v35 = vperm.slane %v409_v29, 0  ;;  %v414_v50 = vperm.slane %v410_v44, 0 }
  0x4d   :  { %336 = vmatmul.f32.gmra.mxu0 %v784_v19 }
  0x4f   :  { %291 = vmatmul.f32.gmra.mxu3 %v145_v40 }
  0x50   :  { %373 = vmatmul.f32.gmra.mxu1 %v784_v19 }
  0xa2   :  { %v125_v52 = vpop.f32.mrf.mxu0 }
  0xa3   :  { %v126_v0 = vadd.f32 %v589_v60, %v125_v52 }
  0xa5   :  { %v141_v53 = vpop.f32.mrf.mxu2  ;;  %v190_v54 = vpop.f32.mrf.mxu1 }
  0xa6   :  { %v191_v8 = vadd.f32 %v190_v54, %v126_v0  ;;  %v142_v26 = vadd.f32 %v589_v60, %v141_v53 }
  0xaa   :  { %v198_v55 = vpop.f32.mrf.mxu3  ;;  %v133_v56 = vpop.f32.mrf.mxu0 }
  0xab   :  { %v134_v13 = vadd.f32 %v589_v60, %v133_v56  ;;  %v199_v33 = vadd.f32 %v198_v55, %v142_v26 }
  0xad   :  { %v149_v57 = vpop.f32.mrf.mxu2  ;;  %v194_v58 = vpop.f32.mrf.mxu1 }
  0xae   :  { %v195_v19 = vadd.f32 %v194_v58, %v134_v13  ;;  %v150_v41 = vadd.f32 %v589_v60, %v149_v57  ;;  %v411_v58 = vrot.slane %v407_v15, 3 }
  0xb0   :  { %v415_v63 = vperm.slane %v411_v58, 0 }
  0xb2   :  { %v202_v61 = vpop.f32.mrf.mxu3  ;;  %v325_v2 = vpop.f32.mrf.mxu0 }
  0xb3   :  { %v203_v48 = vadd.f32 %v202_v61, %v150_v41 }
  0xb5   :  { %v232_v3 = vpop.f32.mrf.mxu2  ;;  %v362_v6 = vpop.f32.mrf.mxu1 }
  0xb6   :  { %v233_v10 = vadd.f32 %v232_v3, %v191_v8  ;;  %v440_v3 = vlaneseq }
  0xba   :  { %v274_v12 = vpop.f32.mrf.mxu3  ;;  %v329_v18 = vpop.f32.mrf.mxu0 }
  0xbb   :  { %v275_v14 = vadd.f32 %v274_v12, %v233_v10 }
  0xbd   :  { %v237_v16 = vpop.f32.mrf.mxu2  ;;  %v326_v17 = vadd.f32 %v325_v2, %v275_v14  ;;  %v366_v22 = vpop.f32.mrf.mxu1 }
  0xbe   :  { %v238_v23 = vadd.f32 %v237_v16, %v195_v19  ;;  %v722_v16 = vmov 0  }
  0xbf   :  { %v363_v20 = vadd.f32 %v362_v6, %v326_v17  ;;  %v837_v6 = vand.u32 127, %v440_v3  ;;  %588 = vset.pattern.permute.xlu1 %v722_v16  ;;  %587 = vset.pattern.permute.xlu0 %v722_v16 }
  0xc0   :  { %586 = vset.pattern.permute.xlu2 %v722_v16 }
  0xc1   :  { %v377_v24 = vmax.f32 %v363_v20, 0.0 }
  0xc2   :  { %v280_v25 = vpop.f32.mrf.mxu3  ;;  %v333_v36 = vpop.f32.mrf.mxu0 }
  0xc3   :  { %v281_v27 = vadd.f32 %v280_v25, %v238_v23  ;;  %v420_v28 = vmul.f32 %v412_v21, %v377_v24 }
  0xc5   :  { %v242_v30 = vpop.f32.mrf.mxu2  ;;  %v330_v31 = vadd.f32 %v329_v18, %v281_v27  ;;  %v424_v32 = vsel %vm86_vm0, %v420_v28, 0.0  ;;  %v370_v40 = vpop.f32.mrf.mxu1 }
  0xc6   :  { %425 = vadd.xlane.f32.xlu0 %v424_v32  ;;  %v243_v37 = vadd.f32 %v242_v30, %v199_v33 }
  0xc7   :  { %v367_v34 = vadd.f32 %v366_v22, %v330_v31 }
  0xc9   :  { %v378_v38 = vmax.f32 %v367_v34, 0.0 }
  0xca   :  { %v286_v39 = vpop.f32.mrf.mxu3  ;;  %v337_v54 = vpop.f32.mrf.mxu0 }
  0xcb   :  { %v287_v42 = vadd.f32 %v286_v39, %v243_v37  ;;  %v421_v43 = vmul.f32 %v413_v35, %v378_v38 }
  0xcd   :  { %v334_v45 = vadd.f32 %v333_v36, %v287_v42  ;;  %v427_v46 = vsel %vm86_vm0, %v421_v43, 0.0  ;;  %v247_v47 = vpop.f32.mrf.mxu2  ;;  %v374_v59 = vpop.f32.mrf.mxu1 }
  0xce   :  { %428 = vadd.xlane.f32.xlu0 %v427_v46  ;;  %v248_v51 = vadd.f32 %v247_v47, %v203_v48 }
  0xcf   :  { %v371_v49 = vadd.f32 %v370_v40, %v334_v45 }
  0xd1   :  { %v379_v52 = vmax.f32 %v371_v49, 0.0 }
  0xd2   :  { %v292_v53 = vpop.f32.mrf.mxu3 }
  0xd3   :  { %v293_v55 = vadd.f32 %v292_v53, %v248_v51  ;;  %v422_v56 = vmul.f32 %v414_v50, %v379_v52 }
  0xd5   :  { %v338_v57 = vadd.f32 %v337_v54, %v293_v55  ;;  %v430_v60 = vsel %vm86_vm0, %v422_v56, 0.0 }
  0xd6   :  { %431 = vadd.xlane.f32.xlu1 %v430_v60 }
  0xd7   :  { %v375_v62 = vadd.f32 %v374_v59, %v338_v57 }
  0xd9   :  { %v380_v0 = vmax.f32 %v375_v62, 0.0 }
  0xdb   :  { %v423_v1 = vmul.f32 %v415_v63, %v380_v0 }
  0xdd   :  { %v433_v61 = vsel %vm86_vm0, %v423_v1, 0.0 }
  0xde   :  { %434 = vadd.xlane.f32.xlu1 %v433_v61 }
 0x139   :  { %v426_v2 = vpop.xlane.xlu0 %425 }
 0x13a   :  { %v442_v9 = vperm.slane %v426_v2, %v837_v6 }
 0x141   :  { %v429_v5 = vpop.xlane.xlu0 %428 }
 0x142   :  { %v443_v7 = vperm.slane %v429_v5, %v837_v6 }
 0x144   :  { %v447_v12 = vsel %vm446_vm4, %v443_v7, %v442_v9 }
 0x149   :  { %v432_v4 = vpop.xlane.xlu1 %431 }
 0x14a   :  { %v444_v8 = vperm.slane %v432_v4, %v837_v6 }
 0x14c   :  { %v449_v13 = vsel %vm448_vm5, %v444_v8, %v447_v12 }
 0x151   :  { %v435_v10 = vpop.xlane.xlu1 %434 }
 0x152   :  { %v445_v11 = vperm.slane %v435_v10, %v837_v6 }
 0x154   :  { %v451_v14 = vsel %vm450_vm6, %v445_v11, %v449_v13 }
 0x155   :  { %v454_v15 = vsel %vm453_vm7, %v451_v14, -inf }
 0x156   :  { %455 = vmax.xlane.f32.xlu2 %v454_v15 }
 0x1c9   :  { %v456_v17 = vpop.xlane.xlu2 %455 }
 0x1ca   :  { %v458_v18 = vperm.slane %v456_v17, 0  ;;  %v459_v19 = vperm.slane %v456_v17, 1  ;;  %v460_v20 = vperm.slane %v456_v17, 2  ;;  %v461_v21 = vperm.slane %v456_v17, 3 }
 0x1cc   :  { %v466_v22 = vsub.f32 %v426_v2, %v458_v18  ;;  %v467_v23 = vsub.f32 %v429_v5, %v459_v19  ;;  %v468_v24 = vsub.f32 %v432_v4, %v460_v20  ;;  %v469_v28 = vsub.f32 %v435_v10, %v461_v21 }
 0x1ce   :  { %v470_v25 = vmul.f32 1.442695, %v466_v22  ;;  %v472_v26 = vmul.f32 1.442695, %v467_v23  ;;  %v474_v27 = vmul.f32 1.442695, %v468_v24 }
 0x1cf   :  { %v476_v29 = vmul.f32 1.442695, %v469_v28 }
 0x1d0   :  { %590 = vpow2.f32 %v470_v25 }
 0x1d1   :  { %592 = vpow2.f32 %v472_v26 }
 0x1d2   :  { %594 = vpow2.f32 %v474_v27 }
 0x1d3   :  { %596 = vpow2.f32 %v476_v29 }
 0x1d6   :  { %v591_v30 = vpop.eup %590 }
 0x1d7   :  { %v593_v31 = vpop.eup %592  ;;  %483 = vperm.xlu2 %586, %v591_v30  }
 0x1d8   :  { %v595_v32 = vpop.eup %594  ;;  %486 = vperm.xlu0 %587, %v593_v31  }
 0x1d9   :  { %489 = vperm.xlu1 %588, %v595_v32   ;;  %v597_v33 = vpop.eup %596 }
 0x1df   :  { %492 = vperm.xlu2 %586, %v597_v33  }
 0x231   :  { %v484_v34 = vpop.permute.xlu2 %483 }
 0x232   :  { %v494_v37 = vperm.slane %v484_v34, %v837_v6 }
 0x239   :  { %v493_v35 = vpop.permute.xlu2 %492 }
 0x23a   :  { %v497_v41 = vperm.slane %v493_v35, %v837_v6 }
 0x24a   :  { %v487_v36 = vpop.permute.xlu0 %486 }
 0x24b   :  { %v490_v38 = vpop.permute.xlu1 %489  ;;  %v495_v39 = vperm.slane %v487_v36, %v837_v6 }
 0x24c   :  { %v496_v40 = vperm.slane %v490_v38, %v837_v6 }
 0x24d   :  { %v498_v42 = vsel %vm446_vm4, %v495_v39, %v494_v37 }
 0x24e   :  { %v499_v43 = vsel %vm448_vm5, %v496_v40, %v498_v42 }
 0x24f   :  { %v500_v44 = vsel %vm450_vm6, %v497_v41, %v499_v43 }
 0x250   :  { %v502_v45 = vsel %vm453_vm7, %v500_v44, 0.0 }
 0x251   :  { %503 = vadd.xlane.f32.xlu2 %v502_v45 }
 0x2c4   :  { %v504_v46 = vpop.xlane.xlu2 %503 }
 0x2c5   :  { %598 = vlog2.f32 %v504_v46 }
 0x2cb   :  { %v599_v47 = vpop.eup %598 }
 0x2cc   :  { %v506_v48 = vmul.f32 0.6931472, %v599_v47 }
 0x2ce   :  { %v510_v49 = vperm.slane %v506_v48, 2  ;;  %v508_v50 = vperm.slane %v506_v48, 0  ;;  %v509_v53 = vperm.slane %v506_v48, 1  ;;  %v511_v55 = vperm.slane %v506_v48, 3 }
 0x2d0   :  { %v518_v51 = vsub.f32 %v468_v24, %v510_v49  ;;  %v516_v52 = vsub.f32 %v466_v22, %v508_v50  ;;  %v517_v54 = vsub.f32 %v467_v23, %v509_v53  ;;  %v519_v56 = vsub.f32 %v469_v28, %v511_v55 }
 0x2d2   :  { %531 = vperm.xlu0 %587, %v518_v51   ;;  %525 = vperm.xlu1 %588, %v516_v52  }
 0x2da   :  { %528 = vperm.xlu1 %588, %v517_v54  }
 0x2e2   :  { %534 = vperm.xlu1 %588, %v519_v56  }
 0x344   :  { %v526_v58 = vpop.permute.xlu1 %525  ;;  %v532_v60 = vpop.permute.xlu0 %531 }
 0x345   :  { %v536_v62 = vperm.slane %v526_v58, %v837_v6  ;;  %v538_v0 = vperm.slane %v532_v60, %v837_v6 }
 0x34c   :  { %v529_v59 = vpop.permute.xlu1 %528 }
 0x34d   :  { %v537_v57 = vperm.slane %v529_v59, %v837_v6 }
 0x34f   :  { %v540_v63 = vsel %vm446_vm4, %v537_v57, %v536_v62 }
 0x350   :  { %v541_v2 = vsel %vm448_vm5, %v538_v0, %v540_v63 }
 0x354   :  { %v535_v1 = vpop.permute.xlu1 %534 }
 0x355   :  { %v539_v61 = vperm.slane %v535_v1, %v837_v6 }
 0x357   :  { %v542_v3 = vsel %vm450_vm6, %v539_v61, %v541_v2 }
 0x358   :  { %544 = vst.msk [vmem:[#allocation10] sm:$0xf] %vm453_vm7, %v542_v3 }
 0x359   :  { %555 = dma.vmem_to_hbm [thread:$0]  %s551_s20, 64, %s553_s23, [#allocation6]  }
 0x35a   :  { %714 = dma.done.wait [#allocation6], 64  }
 0x35b   :  { %715 = vsyncadd [#allocation6], 4294967232 }
 0x35c   :  { %560 = vsyncpa [#allocation5], 1 }
 0x35d   :  { %561 = vsyncpa [#allocation8], 1 }
 0x35e   :  { %562 = vsyncpa [#allocation6], 1 }

</bundles_post_ra>
